<compile_context>
chip_gen: v7x
topology: tpu7x:2x2x1
jax: 0.10.0
libtpu: 0.0.40
codegen_flags: <defaults>
</compile_context>

<pallas_src>
import math
import random

import jax
import jax.numpy as jnp
from jax import lax
from jax.experimental import pallas as pl
from jax.experimental.pallas import tpu as pltpu

_EPS = 1e-12                  # F.normalize default eps
_LANES = 128
_SUBLANES = 8

# channel-score (intra_fd) kernel tiling
_CS_FULL_BLOCK_BYTES = 4 * 1024 * 1024   # single-block fast path for small maps
_CS_TILE_R = 256                          # rows (= b*c) per block when tiling
_CS_TILE_C = 2048                         # lanes (= h*w) per block when tiling

# weighted-SSD (MSE) kernel tiling
_MSE_ROW_TILE = 2048                      # 2048 * 128 * 4 B = 1 MiB per input block
_MSE_SHARDS = 2                           # leading 'parallel' axis → v7x megacore


def _round_up(x, m):
    return ((x + m - 1) // m) * m


def _divisor_tile(n, unit, cap):
    """Largest multiple of `unit` that divides `n` and is <= cap (assumes n % unit == 0)."""
    best = unit
    t = unit
    while t <= min(n, cap):
        if n % t == 0:
            best = t
        t += unit
    return best


# ---------------------------------------------------------------------------
# Pallas kernels
# ---------------------------------------------------------------------------
def _score_kernel(x_ref, o_ref, s1_ref, s2_ref):
    """Per-(b,c) spatial sum of the spatially-L2-normalised map.

    x_ref : (TR, TC) — rows = flattened (b, c), lanes = flattened (h, w) tile.
    o_ref : (TR, 1)  — resident across the spatial ("arbitrary") grid axis.
    Uses sum(x / ||x||) == sum(x) * rsqrt(sum(x^2)), so only two running column
    reductions are kept and the spatial axis can be tiled.  Zero-padded rows/cols
    contribute 0 to both accumulators (pad rows give score 0 and are sliced off).
    """
    c = pl.program_id(1)

    @pl.when(c == 0)
    def _():
        s1_ref[...] = jnp.zeros_like(s1_ref)
        s2_ref[...] = jnp.zeros_like(s2_ref)

    x = x_ref[...].astype(jnp.float32)
    s1_ref[...] += jnp.sum(x, axis=-1, keepdims=True)
    s2_ref[...] += jnp.sum(x * x, axis=-1, keepdims=True)

    @pl.when(c == pl.num_programs(1) - 1)
    def _():
        # rsqrt(max(ssq, eps^2)) == 1 / max(||x||_2, eps)  (EUP path, no divide)
        o_ref[...] = s1_ref[...] * lax.rsqrt(jnp.maximum(s2_ref[...], _EPS * _EPS))


def _wssd_kernel(a_ref, b_ref, o_ref, acc_ref):
    """Sum of squared differences for one shard of the pre-scaled concatenated slab.

    Sublane-first reduction: per tile only VPU adds into a (1, 128) accumulator;
    the single cross-lane (XLU) reduce happens once per shard at the last tile.
    """
    t = pl.program_id(1)

    @pl.when(t == 0)
    def _():
        acc_ref[...] = jnp.zeros_like(acc_ref)

    d = a_ref[...].astype(jnp.float32) - b_ref[...].astype(jnp.float32)
    acc_ref[...] += jnp.sum(d * d, axis=0, keepdims=True)        # (1, 128), VPU only

    @pl.when(t == pl.num_programs(1) - 1)
    def _():
        o_ref[...] = jnp.sum(acc_ref[...], axis=-1, keepdims=True)   # one XLU reduce


# ---------------------------------------------------------------------------
# Pallas wrappers
# ---------------------------------------------------------------------------
def _channel_scores(f):
    """F.normalize(f, p=2, dim=(2,3)).mean([0,2,3]) for one NCHW map -> (C,).

    The feature is read directly in (B*C, H*W) layout (free reshape — no transpose,
    no stack/pad copy).  Small maps go through a single full block; big maps tile
    both axes (rows "parallel", spatial "arbitrary" with running accumulators).
    """
    B, C, H, W = f.shape
    R, HW = B * C, H * W
    x = f.reshape(R, HW)

    if R * HW * x.dtype.itemsize <= _CS_FULL_BLOCK_BYTES:
        tile_r, tile_c = R, HW                       # single block, zero padding
    else:
        if (R % _SUBLANES) or (HW % _LANES):         # rare: big map with odd dims
            x = jnp.pad(x, ((0, _round_up(R, _SUBLANES) - R),
                            (0, _round_up(HW, _LANES) - HW)))
        rp_, cp_ = x.shape
        tile_r = _divisor_tile(rp_, _SUBLANES, _CS_TILE_R)
        tile_c = _divisor_tile(cp_, _LANES, _CS_TILE_C)
    rp, cp = x.shape

    row_scores = pl.pallas_call(
        _score_kernel,
        out_shape=jax.ShapeDtypeStruct((rp, 1), jnp.float32),
        grid=(rp // tile_r, cp // tile_c),
        in_specs=[pl.BlockSpec((tile_r, tile_c), lambda r, c: (r, c))],
        out_specs=pl.BlockSpec((tile_r, 1), lambda r, c: (r, 0)),
        scratch_shapes=[pltpu.VMEM((tile_r, 1), jnp.float32),
                        pltpu.VMEM((tile_r, 1), jnp.float32)],
        compiler_params=pltpu.CompilerParams(
            dimension_semantics=("parallel", "arbitrary")),
    )(x)

    return row_scores[:R, 0].reshape(B, C).sum(axis=0) / (B * H * W)


def _weighted_mse_sum(pairs, weights):
    """sum_i weights[i] * mean((a_i - b_i)^2), as ONE Pallas reduction.

    Each pair is pre-scaled by sqrt(w_i / n_i), so the whole loss is a single sum of
    squared differences over one ragged-concatenated, lane-dense (rows, 128) slab —
    no per-pair max-size padding.  Two balanced shards feed the 'parallel' grid axis.
    """
    a_parts, b_parts = [], []
    for (a, b), w in zip(pairs, weights):
        s = jnp.float32(math.sqrt(w / a.size))
        # TODO(synk): keep the slab in bf16 (in-kernel upcast) when features are bf16.
        a_parts.append(a.reshape(-1).astype(jnp.float32) * s)
        b_parts.append(b.reshape(-1).astype(jnp.float32) * s)
    a_flat = jnp.concatenate(a_parts)
    b_flat = jnp.concatenate(b_parts)

    n = a_flat.size
    rows = (n + _LANES - 1) // _LANES
    tile_rows = min(_MSE_ROW_TILE,
                    max(_SUBLANES,
                        _round_up((rows + _MSE_SHARDS - 1) // _MSE_SHARDS, _SUBLANES)))
    rows_total = _round_up(rows, _MSE_SHARDS * tile_rows)
    shard_rows = rows_total // _MSE_SHARDS

    def slab(v):
        v = jnp.pad(v, (0, rows_total * _LANES - n))
        return v.reshape(_MSE_SHARDS, shard_rows, _LANES)

    out = pl.pallas_call(
        _wssd_kernel,
        out_shape=jax.ShapeDtypeStruct((_MSE_SHARDS, 1, 1), jnp.float32),
        grid=(_MSE_SHARDS, shard_rows // tile_rows),
        in_specs=[pl.BlockSpec((None, tile_rows, _LANES), lambda s, t: (s, t, 0)),
                  pl.BlockSpec((None, tile_rows, _LANES), lambda s, t: (s, t, 0))],
        out_specs=pl.BlockSpec((None, 1, 1), lambda s, t: (s, 0, 0)),
        scratch_shapes=[pltpu.VMEM((1, _LANES), jnp.float32)],
        compiler_params=pltpu.CompilerParams(
            dimension_semantics=("parallel", "arbitrary")),
    )(slab(a_flat), slab(b_flat))

    return jnp.sum(out)


# ---------------------------------------------------------------------------
# Plain-JAX glue
# ---------------------------------------------------------------------------
def adaptive_avg_pool2d(x, out_hw):
    """F.adaptive_avg_pool2d for NCHW inputs."""
    B, C, H, W = x.shape
    oh, ow = out_hw
    if (H, W) == (oh, ow):
        return x
    if H % oh == 0 and W % ow == 0:
        kh, kw = H // oh, W // ow
        return x.reshape(B, C, oh, kh, ow, kw).mean(axis=(3, 5))
    rows = []
    for i in range(oh):
        h0 = (i * H) // oh
        h1 = ((i + 1) * H + oh - 1) // oh
        cols = []
        for j in range(ow):
            w0 = (j * W) // ow
            w1 = ((j + 1) * W + ow - 1) // ow
            cols.append(x[:, :, h0:h1, w0:w1].mean(axis=(2, 3)))
        rows.append(jnp.stack(cols, axis=-1))
    return jnp.stack(rows, axis=-2)


# ---------------------------------------------------------------------------
# Pure (jit-able) forward
# ---------------------------------------------------------------------------
def _kd_forward(feature, feature_decoder, final_up, inter_idx, lambda_x):
    f1, f2, f3, f4 = (feature[i][-1] for i in range(4))
    f1_0, f2_0, f3_0, f4_0 = (feature[i][0] for i in range(4))
    f1_d, f2_d, f3_d = (feature_decoder[i][-1] for i in range(3))
    f1_d_0, f2_d_0, f3_d_0 = (feature_decoder[i][0] for i in range(3))
    final_layer = final_up

    pairs, weights = [], []

    # ------------------------------- intra_fd -------------------------------
    intra_feats = [f1, f2, f3, f4, f1_0, f2_0, f3_0, f4_0,
                   f1_d_0, f2_d_0, f3_d_0, f1_d, f2_d, f3_d]
    intra_w = [1.0 / 4.0] * 8 + [1.0 / 3.0] * 6
    for f, w in zip(intra_feats, intra_w):
        c = f.shape[1]
        if c % 2:
            # TODO(synk): odd channel counts are ill-defined in the reference module.
            raise NotImplementedError("intra_fd requires an even channel count")
        score = _channel_scores(f)                     # one small Pallas call / map
        order = jnp.argsort(-score)                    # torch.sort(descending=True)
        # TODO(synk): gather channels via scalar-prefetch index_map to skip this HBM copy.
        top = jnp.take(f, order[: c // 2], axis=1)
        bot = jnp.take(f, order[c // 2:], axis=1)
        pairs.append((top, bot))
        weights.append(w)

    # ----------------------- inter_fd (teacher = final_up) ------------------
    students = [f1_d, f2_d, f3_d, f1, f2, f3, f4,
                f1_d_0, f2_d_0, f3_d_0, f1_0, f2_0, f3_0, f4_0]
    t_h = final_layer.shape[2]
    pooled_final = {}                                  # one pool per target resolution
    for f in students:
        s_h = f.shape[2]
        if s_h < t_h and s_h not in pooled_final:
            pooled_final[s_h] = adaptive_avg_pool2d(final_layer, (s_h, s_h))
    for f, (idx_s, idx_t) in zip(students, inter_idx):
        s_h = f.shape[2]
        if s_h > t_h:
            f_s, f_t = adaptive_avg_pool2d(f, (t_h, t_h)), final_layer
        elif s_h < t_h:
            f_s, f_t = f, pooled_final[s_h]
        else:
            f_s, f_t = f, final_layer
        f_s_sel = jnp.take(f_s, idx_s, axis=1)
        f_t_sel = lax.stop_gradient(jnp.take(f_t, idx_t, axis=1))   # .detach()
        pairs.append((f_s_sel, f_t_sel))
        weights.append(1.0 / 7.0)

    # all 28 weighted MSEs collapse into one Pallas reduction
    return _weighted_mse_sum(pairs, weights) * lambda_x


_kd_forward_jit = jax.jit(_kd_forward)


# ---------------------------------------------------------------------------
# KDloss (mirrors the PyTorch module's forward)
# ---------------------------------------------------------------------------
class KDloss:
    def __init__(self, lambda_x):
        self.lambda_x = lambda_x

    def __call__(self, feature, feature_decoder, final_up):
        # Host-side random channel selection, in the exact same order / from the same
        # python `random` stream as the reference module, hoisted out of the traced
        # function so the jit stays pure and cacheable.
        students = [feature_decoder[0][-1], feature_decoder[1][-1], feature_decoder[2][-1],
                    feature[0][-1], feature[1][-1], feature[2][-1], feature[3][-1],
                    feature_decoder[0][0], feature_decoder[1][0], feature_decoder[2][0],
                    feature[0][0], feature[1][0], feature[2][0], feature[3][0]]
        t_c = final_up.shape[1]
        inter_idx = []
        for f in students:
            s_c = f.shape[1]
            k = min(s_c, t_c)
            idx_s = jnp.asarray(random.sample(range(s_c), k), dtype=jnp.int32)
            idx_t = jnp.asarray(random.sample(range(t_c), k), dtype=jnp.int32)
            inter_idx.append((idx_s, idx_t))
        return _kd_forward_jit(feature, feature_decoder, final_up, inter_idx,
                               jnp.float32(self.lambda_x))


# ---------------------------------------------------------------------------
if __name__ == "__main__":
    random.seed(0)                      # deterministic channel sampling (inter_fd)
    B = 2
    enc_shapes = [(8, 16), (16, 8), (16, 8), (8, 4)]   # (C, H) per encoder level
    dec_shapes = [(8, 16), (16, 8), (8, 4)]            # (C, H) per decoder level

    keys = iter(jax.random.split(jax.random.PRNGKey(0), 16))

    def mk(c, h):
        return jax.random.normal(next(keys), (B, c, h, h), dtype=jnp.float32)

    feature = [[mk(c, h), mk(c, h)] for (c, h) in enc_shapes]          # [level][0 / -1]
    feature_decoder = [[mk(c, h), mk(c, h)] for (c, h) in dec_shapes]  # [level][0 / -1]
    final_up = jax.random.normal(next(keys), (B, 4, 16, 16), dtype=jnp.float32)

    kd = KDloss(lambda_x=0.5)
    loss = kd(feature, feature_decoder, final_up)
    loss = jax.block_until_ready(loss)
    assert bool(jnp.isfinite(loss))
    print("KERNEL_OK")
</pallas_src>

<mosaic_0001>
module attributes {stable_mosaic.version = 11 : i64} {
  func.func @_score_kernel(%arg0: i32, %arg1: i32, %arg2: memref<16x16xf32, #tpu.memory_space<vmem>>, %arg3: memref<16x1xf32, #tpu.memory_space<vmem>>, %arg4: memref<16x1xf32, #tpu.memory_space<vmem>>, %arg5: memref<16x1xf32, #tpu.memory_space<vmem>>) attributes {dimension_semantics = [#tpu.dimension_semantics<parallel>, #tpu.dimension_semantics<arbitrary>], iteration_bounds = array<i64: 1, 1>, scalar_prefetch = 0 : i64, scratch_operands = 2 : i64, tpu.core_type = #tpu.core_type<tc>, window_params = [{transform_indices = @transform_0, window_bounds = array<i64: 16, 16>}, {transform_indices = @transform_1, window_bounds = array<i64: 16, 1>}]} {
    %c0_i32 = arith.constant 0 : i32
    %0 = arith.cmpi eq, %arg1, %c0_i32 : i32
    %1 = arith.extui %0 : i1 to i32
    %c0_i32_0 = arith.constant 0 : i32
    %2 = arith.cmpi ne, %1, %c0_i32_0 : i32
    scf.if %2 {
      %cst_13 = arith.constant 0.000000e+00 : f32
      %18 = vector.broadcast %cst_13 : f32 to vector<16x1xf32>
      %c0_14 = arith.constant 0 : index
      %c0_15 = arith.constant 0 : index
      %19 = vector.load %arg4[%c0_14, %c0_15] : memref<16x1xf32, #tpu.memory_space<vmem>>, vector<16x1xf32>
      tpu.vector_store %arg4[%c0_14, %c0_15], %18 {strides = array<i32>} : memref<16x1xf32, #tpu.memory_space<vmem>>, vector<16x1xf32>,
      %cst_16 = arith.constant 0.000000e+00 : f32
      %20 = vector.broadcast %cst_16 : f32 to vector<16x1xf32>
      %c0_17 = arith.constant 0 : index
      %c0_18 = arith.constant 0 : index
      %21 = vector.load %arg5[%c0_17, %c0_18] : memref<16x1xf32, #tpu.memory_space<vmem>>, vector<16x1xf32>
      tpu.vector_store %arg5[%c0_17, %c0_18], %20 {strides = array<i32>} : memref<16x1xf32, #tpu.memory_space<vmem>>, vector<16x1xf32>,
    } else {
    }
    %c0 = arith.constant 0 : index
    %c0_1 = arith.constant 0 : index
    %3 = vector.load %arg2[%c0, %c0_1] : memref<16x16xf32, #tpu.memory_space<vmem>>, vector<16x16xf32>
    %c0_2 = arith.constant 0 : index
    %c0_3 = arith.constant 0 : index
    %4 = vector.load %arg4[%c0_2, %c0_3] : memref<16x1xf32, #tpu.memory_space<vmem>>, vector<16x1xf32>
    %cst = arith.constant dense<0.000000e+00> : vector<16xf32>
    %5 = vector.multi_reduction <add>, %3, %cst [1] : vector<16x16xf32> to vector<16xf32>
    %6 = vector.shape_cast %5 : vector<16xf32> to vector<16x1xf32>
    %7 = arith.addf %4, %6 : vector<16x1xf32>
    %c0_4 = arith.constant 0 : index
    %c0_5 = arith.constant 0 : index
    %8 = vector.load %arg4[%c0_4, %c0_5] : memref<16x1xf32, #tpu.memory_space<vmem>>, vector<16x1xf32>
    tpu.vector_store %arg4[%c0_4, %c0_5], %7 {strides = array<i32>} : memref<16x1xf32, #tpu.memory_space<vmem>>, vector<16x1xf32>,
    %c0_6 = arith.constant 0 : index
    %c0_7 = arith.constant 0 : index
    %9 = vector.load %arg5[%c0_6, %c0_7] : memref<16x1xf32, #tpu.memory_space<vmem>>, vector<16x1xf32>
    %10 = arith.mulf %3, %3 : vector<16x16xf32>
    %cst_8 = arith.constant dense<0.000000e+00> : vector<16xf32>
    %11 = vector.multi_reduction <add>, %10, %cst_8 [1] : vector<16x16xf32> to vector<16xf32>
    %12 = vector.shape_cast %11 : vector<16xf32> to vector<16x1xf32>
    %13 = arith.addf %9, %12 : vector<16x1xf32>
    %c0_9 = arith.constant 0 : index
    %c0_10 = arith.constant 0 : index
    %14 = vector.load %arg5[%c0_9, %c0_10] : memref<16x1xf32, #tpu.memory_space<vmem>>, vector<16x1xf32>
    tpu.vector_store %arg5[%c0_9, %c0_10], %13 {strides = array<i32>} : memref<16x1xf32, #tpu.memory_space<vmem>>, vector<16x1xf32>,
    %c0_i32_11 = arith.constant 0 : i32
    %15 = arith.cmpi eq, %arg1, %c0_i32_11 : i32
    %16 = arith.extui %15 : i1 to i32
    %c0_i32_12 = arith.constant 0 : i32
    %17 = arith.cmpi ne, %16, %c0_i32_12 : i32
    scf.if %17 {
      %c0_13 = arith.constant 0 : index
      %c0_14 = arith.constant 0 : index
      %18 = vector.load %arg4[%c0_13, %c0_14] : memref<16x1xf32, #tpu.memory_space<vmem>>, vector<16x1xf32>
      %c0_15 = arith.constant 0 : index
      %c0_16 = arith.constant 0 : index
      %19 = vector.load %arg5[%c0_15, %c0_16] : memref<16x1xf32, #tpu.memory_space<vmem>>, vector<16x1xf32>
      %cst_17 = arith.constant 1.000000e-24 : f32
      %20 = vector.broadcast %cst_17 : f32 to vector<16x1xf32>
      %21 = arith.maximumf %19, %20 : vector<16x1xf32>
      %22 = math.rsqrt %21 : vector<16x1xf32>
      %23 = arith.mulf %18, %22 : vector<16x1xf32>
      %c0_18 = arith.constant 0 : index
      %c0_19 = arith.constant 0 : index
      %24 = vector.load %arg3[%c0_18, %c0_19] : memref<16x1xf32, #tpu.memory_space<vmem>>, vector<16x1xf32>
      tpu.vector_store %arg3[%c0_18, %c0_19], %23 {strides = array<i32>} : memref<16x1xf32, #tpu.memory_space<vmem>>, vector<16x1xf32>,
    } else {
    }
    return
  }
  func.func @transform_0(%arg0: i32, %arg1: i32) -> (i32, i32) {
    %c0_i32 = arith.constant 0 : i32
    return %arg0, %arg1 : i32, i32
  }
  func.func @transform_1(%arg0: i32, %arg1: i32) -> (i32, i32) {
    %c0_i32 = arith.constant 0 : i32
    %c0_i32_0 = arith.constant 0 : i32
    return %arg0, %c0_i32 : i32, i32
  }
}

module attributes {stable_mosaic.version = 11 : i64} {
  func.func @_score_kernel(%arg0: i32, %arg1: i32, %arg2: memref<16x256xf32, #tpu.memory_space<vmem>>, %arg3: memref<16x1xf32, #tpu.memory_space<vmem>>, %arg4: memref<16x1xf32, #tpu.memory_space<vmem>>, %arg5: memref<16x1xf32, #tpu.memory_space<vmem>>) attributes {dimension_semantics = [#tpu.dimension_semantics<parallel>, #tpu.dimension_semantics<arbitrary>], iteration_bounds = array<i64: 1, 1>, scalar_prefetch = 0 : i64, scratch_operands = 2 : i64, tpu.core_type = #tpu.core_type<tc>, window_params = [{transform_indices = @transform_0, window_bounds = array<i64: 16, 256>}, {transform_indices = @transform_1, window_bounds = array<i64: 16, 1>}]} {
    %c0_i32 = arith.constant 0 : i32
    %0 = arith.cmpi eq, %arg1, %c0_i32 : i32
    %1 = arith.extui %0 : i1 to i32
    %c0_i32_0 = arith.constant 0 : i32
    %2 = arith.cmpi ne, %1, %c0_i32_0 : i32
    scf.if %2 {
      %cst_13 = arith.constant 0.000000e+00 : f32
      %18 = vector.broadcast %cst_13 : f32 to vector<16x1xf32>
      %c0_14 = arith.constant 0 : index
      %c0_15 = arith.constant 0 : index
      %19 = vector.load %arg4[%c0_14, %c0_15] : memref<16x1xf32, #tpu.memory_space<vmem>>, vector<16x1xf32>
      tpu.vector_store %arg4[%c0_14, %c0_15], %18 {strides = array<i32>} : memref<16x1xf32, #tpu.memory_space<vmem>>, vector<16x1xf32>,
      %cst_16 = arith.constant 0.000000e+00 : f32
      %20 = vector.broadcast %cst_16 : f32 to vector<16x1xf32>
      %c0_17 = arith.constant 0 : index
      %c0_18 = arith.constant 0 : index
      %21 = vector.load %arg5[%c0_17, %c0_18] : memref<16x1xf32, #tpu.memory_space<vmem>>, vector<16x1xf32>
      tpu.vector_store %arg5[%c0_17, %c0_18], %20 {strides = array<i32>} : memref<16x1xf32, #tpu.memory_space<vmem>>, vector<16x1xf32>,
    } else {
    }
    %c0 = arith.constant 0 : index
    %c0_1 = arith.constant 0 : index
    %3 = vector.load %arg2[%c0, %c0_1] : memref<16x256xf32, #tpu.memory_space<vmem>>, vector<16x256xf32>
    %c0_2 = arith.constant 0 : index
    %c0_3 = arith.constant 0 : index
    %4 = vector.load %arg4[%c0_2, %c0_3] : memref<16x1xf32, #tpu.memory_space<vmem>>, vector<16x1xf32>
    %cst = arith.constant dense<0.000000e+00> : vector<16xf32>
    %5 = vector.multi_reduction <add>, %3, %cst [1] : vector<16x256xf32> to vector<16xf32>
    %6 = vector.shape_cast %5 : vector<16xf32> to vector<16x1xf32>
    %7 = arith.addf %4, %6 : vector<16x1xf32>
    %c0_4 = arith.constant 0 : index
    %c0_5 = arith.constant 0 : index
    %8 = vector.load %arg4[%c0_4, %c0_5] : memref<16x1xf32, #tpu.memory_space<vmem>>, vector<16x1xf32>
    tpu.vector_store %arg4[%c0_4, %c0_5], %7 {strides = array<i32>} : memref<16x1xf32, #tpu.memory_space<vmem>>, vector<16x1xf32>,
    %c0_6 = arith.constant 0 : index
    %c0_7 = arith.constant 0 : index
    %9 = vector.load %arg5[%c0_6, %c0_7] : memref<16x1xf32, #tpu.memory_space<vmem>>, vector<16x1xf32>
    %10 = arith.mulf %3, %3 : vector<16x256xf32>
    %cst_8 = arith.constant dense<0.000000e+00> : vector<16xf32>
    %11 = vector.multi_reduction <add>, %10, %cst_8 [1] : vector<16x256xf32> to vector<16xf32>
    %12 = vector.shape_cast %11 : vector<16xf32> to vector<16x1xf32>
    %13 = arith.addf %9, %12 : vector<16x1xf32>
    %c0_9 = arith.constant 0 : index
    %c0_10 = arith.constant 0 : index
    %14 = vector.load %arg5[%c0_9, %c0_10] : memref<16x1xf32, #tpu.memory_space<vmem>>, vector<16x1xf32>
    tpu.vector_store %arg5[%c0_9, %c0_10], %13 {strides = array<i32>} : memref<16x1xf32, #tpu.memory_space<vmem>>, vector<16x1xf32>,
    %c0_i32_11 = arith.constant 0 : i32
    %15 = arith.cmpi eq, %arg1, %c0_i32_11 : i32
    %16 = arith.extui %15 : i1 to i32
    %c0_i32_12 = arith.constant 0 : i32
    %17 = arith.cmpi ne, %16, %c0_i32_12 : i32
    scf.if %17 {
      %c0_13 = arith.constant 0 : index
      %c0_14 = arith.constant 0 : index
      %18 = vector.load %arg4[%c0_13, %c0_14] : memref<16x1xf32, #tpu.memory_space<vmem>>, vector<16x1xf32>
      %c0_15 = arith.constant 0 : index
      %c0_16 = arith.constant 0 : index
      %19 = vector.load %arg5[%c0_15, %c0_16] : memref<16x1xf32, #tpu.memory_space<vmem>>, vector<16x1xf32>
      %cst_17 = arith.constant 1.000000e-24 : f32
      %20 = vector.broadcast %cst_17 : f32 to vector<16x1xf32>
      %21 = arith.maximumf %19, %20 : vector<16x1xf32>
      %22 = math.rsqrt %21 : vector<16x1xf32>
      %23 = arith.mulf %18, %22 : vector<16x1xf32>
      %c0_18 = arith.constant 0 : index
      %c0_19 = arith.constant 0 : index
      %24 = vector.load %arg3[%c0_18, %c0_19] : memref<16x1xf32, #tpu.memory_space<vmem>>, vector<16x1xf32>
      tpu.vector_store %arg3[%c0_18, %c0_19], %23 {strides = array<i32>} : memref<16x1xf32, #tpu.memory_space<vmem>>, vector<16x1xf32>,
    } else {
    }
    return
  }
  func.func @transform_0(%arg0: i32, %arg1: i32) -> (i32, i32) {
    %c0_i32 = arith.constant 0 : i32
    return %arg0, %arg1 : i32, i32
  }
  func.func @transform_1(%arg0: i32, %arg1: i32) -> (i32, i32) {
    %c0_i32 = arith.constant 0 : i32
    %c0_i32_0 = arith.constant 0 : i32
    return %arg0, %c0_i32 : i32, i32
  }
}

module attributes {stable_mosaic.version = 11 : i64} {
  func.func @_score_kernel(%arg0: i32, %arg1: i32, %arg2: memref<32x64xf32, #tpu.memory_space<vmem>>, %arg3: memref<32x1xf32, #tpu.memory_space<vmem>>, %arg4: memref<32x1xf32, #tpu.memory_space<vmem>>, %arg5: memref<32x1xf32, #tpu.memory_space<vmem>>) attributes {dimension_semantics = [#tpu.dimension_semantics<parallel>, #tpu.dimension_semantics<arbitrary>], iteration_bounds = array<i64: 1, 1>, scalar_prefetch = 0 : i64, scratch_operands = 2 : i64, tpu.core_type = #tpu.core_type<tc>, window_params = [{transform_indices = @transform_0, window_bounds = array<i64: 32, 64>}, {transform_indices = @transform_1, window_bounds = array<i64: 32, 1>}]} {
    %c0_i32 = arith.constant 0 : i32
    %0 = arith.cmpi eq, %arg1, %c0_i32 : i32
    %1 = arith.extui %0 : i1 to i32
    %c0_i32_0 = arith.constant 0 : i32
    %2 = arith.cmpi ne, %1, %c0_i32_0 : i32
    scf.if %2 {
      %cst_13 = arith.constant 0.000000e+00 : f32
      %18 = vector.broadcast %cst_13 : f32 to vector<32x1xf32>
      %c0_14 = arith.constant 0 : index
      %c0_15 = arith.constant 0 : index
      %19 = vector.load %arg4[%c0_14, %c0_15] : memref<32x1xf32, #tpu.memory_space<vmem>>, vector<32x1xf32>
      tpu.vector_store %arg4[%c0_14, %c0_15], %18 {strides = array<i32>} : memref<32x1xf32, #tpu.memory_space<vmem>>, vector<32x1xf32>,
      %cst_16 = arith.constant 0.000000e+00 : f32
      %20 = vector.broadcast %cst_16 : f32 to vector<32x1xf32>
      %c0_17 = arith.constant 0 : index
      %c0_18 = arith.constant 0 : index
      %21 = vector.load %arg5[%c0_17, %c0_18] : memref<32x1xf32, #tpu.memory_space<vmem>>, vector<32x1xf32>
      tpu.vector_store %arg5[%c0_17, %c0_18], %20 {strides = array<i32>} : memref<32x1xf32, #tpu.memory_space<vmem>>, vector<32x1xf32>,
    } else {
    }
    %c0 = arith.constant 0 : index
    %c0_1 = arith.constant 0 : index
    %3 = vector.load %arg2[%c0, %c0_1] : memref<32x64xf32, #tpu.memory_space<vmem>>, vector<32x64xf32>
    %c0_2 = arith.constant 0 : index
    %c0_3 = arith.constant 0 : index
    %4 = vector.load %arg4[%c0_2, %c0_3] : memref<32x1xf32, #tpu.memory_space<vmem>>, vector<32x1xf32>
    %cst = arith.constant dense<0.000000e+00> : vector<32xf32>
    %5 = vector.multi_reduction <add>, %3, %cst [1] : vector<32x64xf32> to vector<32xf32>
    %6 = vector.shape_cast %5 : vector<32xf32> to vector<32x1xf32>
    %7 = arith.addf %4, %6 : vector<32x1xf32>
    %c0_4 = arith.constant 0 : index
    %c0_5 = arith.constant 0 : index
    %8 = vector.load %arg4[%c0_4, %c0_5] : memref<32x1xf32, #tpu.memory_space<vmem>>, vector<32x1xf32>
    tpu.vector_store %arg4[%c0_4, %c0_5], %7 {strides = array<i32>} : memref<32x1xf32, #tpu.memory_space<vmem>>, vector<32x1xf32>,
    %c0_6 = arith.constant 0 : index
    %c0_7 = arith.constant 0 : index
    %9 = vector.load %arg5[%c0_6, %c0_7] : memref<32x1xf32, #tpu.memory_space<vmem>>, vector<32x1xf32>
    %10 = arith.mulf %3, %3 : vector<32x64xf32>
    %cst_8 = arith.constant dense<0.000000e+00> : vector<32xf32>
    %11 = vector.multi_reduction <add>, %10, %cst_8 [1] : vector<32x64xf32> to vector<32xf32>
    %12 = vector.shape_cast %11 : vector<32xf32> to vector<32x1xf32>
    %13 = arith.addf %9, %12 : vector<32x1xf32>
    %c0_9 = arith.constant 0 : index
    %c0_10 = arith.constant 0 : index
    %14 = vector.load %arg5[%c0_9, %c0_10] : memref<32x1xf32, #tpu.memory_space<vmem>>, vector<32x1xf32>
    tpu.vector_store %arg5[%c0_9, %c0_10], %13 {strides = array<i32>} : memref<32x1xf32, #tpu.memory_space<vmem>>, vector<32x1xf32>,
    %c0_i32_11 = arith.constant 0 : i32
    %15 = arith.cmpi eq, %arg1, %c0_i32_11 : i32
    %16 = arith.extui %15 : i1 to i32
    %c0_i32_12 = arith.constant 0 : i32
    %17 = arith.cmpi ne, %16, %c0_i32_12 : i32
    scf.if %17 {
      %c0_13 = arith.constant 0 : index
      %c0_14 = arith.constant 0 : index
      %18 = vector.load %arg4[%c0_13, %c0_14] : memref<32x1xf32, #tpu.memory_space<vmem>>, vector<32x1xf32>
      %c0_15 = arith.constant 0 : index
      %c0_16 = arith.constant 0 : index
      %19 = vector.load %arg5[%c0_15, %c0_16] : memref<32x1xf32, #tpu.memory_space<vmem>>, vector<32x1xf32>
      %cst_17 = arith.constant 1.000000e-24 : f32
      %20 = vector.broadcast %cst_17 : f32 to vector<32x1xf32>
      %21 = arith.maximumf %19, %20 : vector<32x1xf32>
      %22 = math.rsqrt %21 : vector<32x1xf32>
      %23 = arith.mulf %18, %22 : vector<32x1xf32>
      %c0_18 = arith.constant 0 : index
      %c0_19 = arith.constant 0 : index
      %24 = vector.load %arg3[%c0_18, %c0_19] : memref<32x1xf32, #tpu.memory_space<vmem>>, vector<32x1xf32>
      tpu.vector_store %arg3[%c0_18, %c0_19], %23 {strides = array<i32>} : memref<32x1xf32, #tpu.memory_space<vmem>>, vector<32x1xf32>,
    } else {
    }
    return
  }
  func.func @transform_0(%arg0: i32, %arg1: i32) -> (i32, i32) {
    %c0_i32 = arith.constant 0 : i32
    return %arg0, %arg1 : i32, i32
  }
  func.func @transform_1(%arg0: i32, %arg1: i32) -> (i32, i32) {
    %c0_i32 = arith.constant 0 : i32
    %c0_i32_0 = arith.constant 0 : i32
    return %arg0, %c0_i32 : i32, i32
  }
}

module attributes {stable_mosaic.version = 11 : i64} {
  func.func @_wssd_kernel(%arg0: i32, %arg1: i32, %arg2: memref<1x104x128xf32, #tpu.memory_space<vmem>>, %arg3: memref<1x104x128xf32, #tpu.memory_space<vmem>>, %arg4: memref<1x1x1xf32, #tpu.memory_space<vmem>>, %arg5: memref<1x128xf32, #tpu.memory_space<vmem>>) attributes {dimension_semantics = [#tpu.dimension_semantics<parallel>, #tpu.dimension_semantics<arbitrary>], iteration_bounds = array<i64: 2, 1>, scalar_prefetch = 0 : i64, scratch_operands = 1 : i64, tpu.core_type = #tpu.core_type<tc>, window_params = [{transform_indices = @transform_0, window_bounds = array<i64: 1, 104, 128>}, {transform_indices = @transform_1, window_bounds = array<i64: 1, 104, 128>}, {transform_indices = @transform_2, window_bounds = array<i64: 1, 1, 1>}]} {
    %c0_i32 = arith.constant 0 : i32
    %0 = arith.cmpi eq, %arg1, %c0_i32 : i32
    %1 = arith.extui %0 : i1 to i32
    %c0_i32_0 = arith.constant 0 : i32
    %2 = arith.cmpi ne, %1, %c0_i32_0 : i32
    scf.if %2 {
      %cst_12 = arith.constant 0.000000e+00 : f32
      %17 = vector.broadcast %cst_12 : f32 to vector<1x128xf32>
      %c0_13 = arith.constant 0 : index
      %c0_14 = arith.constant 0 : index
      %18 = vector.load %arg5[%c0_13, %c0_14] : memref<1x128xf32, #tpu.memory_space<vmem>>, vector<1x128xf32>
      tpu.vector_store %arg5[%c0_13, %c0_14], %17 {strides = array<i32>} : memref<1x128xf32, #tpu.memory_space<vmem>>, vector<1x128xf32>,
    } else {
    }
    %c0 = arith.constant 0 : index
    %c0_1 = arith.constant 0 : index
    %c0_2 = arith.constant 0 : index
    %3 = vector.load %arg2[%c0, %c0_1, %c0_2] : memref<1x104x128xf32, #tpu.memory_space<vmem>>, vector<1x104x128xf32>
    %4 = vector.shape_cast %3 : vector<1x104x128xf32> to vector<104x128xf32>
    %c0_3 = arith.constant 0 : index
    %c0_4 = arith.constant 0 : index
    %c0_5 = arith.constant 0 : index
    %5 = vector.load %arg3[%c0_3, %c0_4, %c0_5] : memref<1x104x128xf32, #tpu.memory_space<vmem>>, vector<1x104x128xf32>
    %6 = vector.shape_cast %5 : vector<1x104x128xf32> to vector<104x128xf32>
    %7 = arith.subf %4, %6 : vector<104x128xf32>
    %c0_6 = arith.constant 0 : index
    %c0_7 = arith.constant 0 : index
    %8 = vector.load %arg5[%c0_6, %c0_7] : memref<1x128xf32, #tpu.memory_space<vmem>>, vector<1x128xf32>
    %9 = arith.mulf %7, %7 : vector<104x128xf32>
    %cst = arith.constant dense<0.000000e+00> : vector<128xf32>
    %10 = vector.multi_reduction <add>, %9, %cst [0] : vector<104x128xf32> to vector<128xf32>
    %11 = vector.shape_cast %10 : vector<128xf32> to vector<1x128xf32>
    %12 = arith.addf %8, %11 : vector<1x128xf32>
    %c0_8 = arith.constant 0 : index
    %c0_9 = arith.constant 0 : index
    %13 = vector.load %arg5[%c0_8, %c0_9] : memref<1x128xf32, #tpu.memory_space<vmem>>, vector<1x128xf32>
    tpu.vector_store %arg5[%c0_8, %c0_9], %12 {strides = array<i32>} : memref<1x128xf32, #tpu.memory_space<vmem>>, vector<1x128xf32>,
    %c0_i32_10 = arith.constant 0 : i32
    %14 = arith.cmpi eq, %arg1, %c0_i32_10 : i32
    %15 = arith.extui %14 : i1 to i32
    %c0_i32_11 = arith.constant 0 : i32
    %16 = arith.cmpi ne, %15, %c0_i32_11 : i32
    scf.if %16 {
      %c0_12 = arith.constant 0 : index
      %c0_13 = arith.constant 0 : index
      %17 = vector.load %arg5[%c0_12, %c0_13] : memref<1x128xf32, #tpu.memory_space<vmem>>, vector<1x128xf32>
      %cst_14 = arith.constant dense<0.000000e+00> : vector<1xf32>
      %18 = vector.multi_reduction <add>, %17, %cst_14 [1] : vector<1x128xf32> to vector<1xf32>
      %19 = vector.shape_cast %18 : vector<1xf32> to vector<1x1xf32>
      %c0_15 = arith.constant 0 : index
      %c0_16 = arith.constant 0 : index
      %c0_17 = arith.constant 0 : index
      %20 = vector.load %arg4[%c0_15, %c0_16, %c0_17] : memref<1x1x1xf32, #tpu.memory_space<vmem>>, vector<1x1x1xf32>
      %21 = vector.shape_cast %20 : vector<1x1x1xf32> to vector<1x1xf32>
      %22 = vector.shape_cast %19 : vector<1x1xf32> to vector<1x1x1xf32>
      tpu.vector_store %arg4[%c0_15, %c0_16, %c0_17], %22 {strides = array<i32>} : memref<1x1x1xf32, #tpu.memory_space<vmem>>, vector<1x1x1xf32>,
    } else {
    }
    return
  }
  func.func @transform_0(%arg0: i32, %arg1: i32) -> (i32, i32, i32) {
    %c0_i32 = arith.constant 0 : i32
    %c0_i32_0 = arith.constant 0 : i32
    return %arg0, %arg1, %c0_i32 : i32, i32, i32
  }
  func.func @transform_1(%arg0: i32, %arg1: i32) -> (i32, i32, i32) {
    %c0_i32 = arith.constant 0 : i32
    %c0_i32_0 = arith.constant 0 : i32
    return %arg0, %arg1, %c0_i32 : i32, i32, i32
  }
  func.func @transform_2(%arg0: i32, %arg1: i32) -> (i32, i32, i32) {
    %c0_i32 = arith.constant 0 : i32
    %c0_i32_0 = arith.constant 0 : i32
    %c0_i32_1 = arith.constant 0 : i32
    return %arg0, %c0_i32, %c0_i32_0 : i32, i32, i32
  }
}

</mosaic_0001>

<bundles_post_ra>
// kernel: squeeze.21
= control target key start
LH: loop header
LB: loop body
LE: loop exit
PB: predicated region body
PF: predicated region fallthrough
CT: control target
= control target key end

     0   :  { %vm7_vm0 = vcmask 64512   ;;  %s39_s0 = inlined_call_operand.vmem [shape: f32[16], index: 0, kind: input, shape index: {}]   ;;  %s40_s1 = inlined_call_operand.vmem [shape: f32[2,8], index: 1, kind: output, shape index: {}]  }
   0x1   :  { %v4_v0 = vld [vmem:[%s39_s0] sm:$0x1]  ;;  %s22_s0 = smov 120  }
   0x2   :  { %5 = vst [vmem:[#allocation1] sm:$0x1] %v4_v0 }
   0x9   :  { %v9_v1 = vld [vmem:[#allocation1] sm:$0x1]  }
   0xa   :  { %v6_v2 = vld [vmem:[#allocation1] sm:$0x1]   ;;  %10 = vrot.lane.b32.xlu0 %v9_v1, %s22_s0 }
   0xb   :  { %8 = vst.msk [vmem:[#allocation0] sm:$0x1] %vm7_vm0, %v6_v2  }
  0x7c   :  { %v11_v3 = vpop.permute.xlu0 %10  }
  0x7d   :  { %14 = vst.msk [vmem:[#allocation0 + $0x1] sm:$0x1] %vm7_vm0, %v11_v3  }
  0x84   :  { %v18_v4 = vld [vmem:[#allocation0] sm:$0x3] }
  0x85   :  { %20 = vst [vmem:[%s40_s1] sm:$0x3] %v18_v4 }

// kernel: _kd_forward.22
= control target key start
LH: loop header
LB: loop body
LE: loop exit
PB: predicated region body
PF: predicated region fallthrough
CT: control target
= control target key end

     0   :  { %vm12_vm0 = vcmask 7168   ;;  %vm21_vm1 = vcmask 130048   ;;  %v71_v2 = vmov 0.0   ;;  %s104_s0 = inlined_call_operand.vmem [shape: f32[16,16], index: 0, kind: input, shape index: {}]   ;;  %s105_s1 = inlined_call_operand.vmem [shape: f32[16,1], index: 1, kind: output, shape index: {}]  }
   0x1   :  { %v17_v0 = vld [vmem:[%s104_s0] sm:$0xff]  ;;  %v18_v1 = vld [vmem:[%s104_s0 + $0x8] sm:$0xff]  ;;  %15 = vst.msk [vmem:[#allocation3] sm:$0xff] %vm12_vm0, %v71_v2  ;;  %13 = vst.msk [vmem:[#allocation2] sm:$0xff] %vm12_vm0, %v71_v2 }
   0x2   :  { %14 = vst.msk [vmem:[#allocation2 + $0x8] sm:$0xff] %vm12_vm0, %v71_v2  ;;  %16 = vst.msk [vmem:[#allocation3 + $0x8] sm:$0xff] %vm12_vm0, %v71_v2  ;;  %v35_v3 = vmul.f32 %v17_v0, %v17_v0  ;;  %v36_v4 = vmul.f32 %v18_v1, %v18_v1  ;;  %v22_v5 = vsel %vm21_vm1, %v17_v0, 0.0  ;;  %v25_v7 = vsel %vm21_vm1, %v18_v1, 0.0 }
   0x3   :  { %23 = vadd.xlane.f32.xlu1 %v22_v5 }
   0x4   :  { %v37_v6 = vsel %vm21_vm1, %v35_v3, 0.0  ;;  %v40_v8 = vsel %vm21_vm1, %v36_v4, 0.0 }
   0x5   :  { %38 = vadd.xlane.f32.xlu0 %v37_v6 }
   0x7   :  { %26 = vadd.xlane.f32.xlu1 %v25_v7 }
   0x8   :  { %v19_v9 = vld [vmem:[#allocation2] sm:$0xff]  ;;  %v33_v10 = vld [vmem:[#allocation3] sm:$0xff] }
   0x9   :  { %41 = vadd.xlane.f32.xlu0 %v40_v8  ;;  %v20_v14 = vld [vmem:[#allocation2 + $0x8] sm:$0xff]  ;;  %v34_v16 = vld [vmem:[#allocation3 + $0x8] sm:$0xff] }
  0x90   :  { %v24_v11 = vpop.xlane.xlu1 %23 }
  0x91   :  { %v28_v12 = vadd.f32 %v24_v11, %v19_v9 }
  0x92   :  { %v39_v13 = vpop.xlane.xlu0 %38 }
  0x93   :  { %v43_v15 = vadd.f32 %v39_v13, %v33_v10  ;;  %31 = vst.msk [vmem:[#allocation2] sm:$0xff] %vm12_vm0, %v28_v12 }
  0x94   :  { %v27_v17 = vpop.xlane.xlu1 %26 }
  0x95   :  { %45 = vst.msk [vmem:[#allocation3] sm:$0xff] %vm12_vm0, %v43_v15  ;;  %v29_v18 = vadd.f32 %v27_v17, %v20_v14 }
  0x96   :  { %v42_v19 = vpop.xlane.xlu0 %41 }
  0x97   :  { %v44_v20 = vadd.f32 %v42_v19, %v34_v16  ;;  %32 = vst.msk [vmem:[#allocation2 + $0x8] sm:$0xff] %vm12_vm0, %v29_v18 }
  0x99   :  { %46 = vst.msk [vmem:[#allocation3 + $0x8] sm:$0xff] %vm12_vm0, %v44_v20 }
  0x9a   :  { %v50_v25 = vld [vmem:[#allocation2] sm:$0xff] }
  0x9c   :  { %v52_v21 = vld [vmem:[#allocation3] sm:$0xff] }
  0x9d   :  { %v54_v22 = vmax.f32 %v52_v21, 1e-24 }
  0x9e   :  { %v51_v28 = vld [vmem:[#allocation2 + $0x8] sm:$0xff] }
  0x9f   :  { %67 = vrsqrt.f32 %v54_v22 }
  0xa0   :  { %v53_v23 = vld [vmem:[#allocation3 + $0x8] sm:$0xff] }
  0xa1   :  { %v55_v24 = vmax.f32 %v53_v23, 1e-24 }
  0xa3   :  { %69 = vrsqrt.f32 %v55_v24 }
  0xa9   :  { %v68_v26 = vpop.eup %67 }
  0xaa   :  { %v58_v27 = vmul.f32 %v68_v26, %v50_v25 }
  0xac   :  { %60 = vst.msk [vmem:[%s105_s1] sm:$0xff] %vm12_vm0, %v58_v27 }
  0xad   :  { %v70_v29 = vpop.eup %69 }
  0xae   :  { %v59_v30 = vmul.f32 %v70_v29, %v51_v28 }
  0xb0   :  { %61 = vst.msk [vmem:[%s105_s1 + $0x8] sm:$0xff] %vm12_vm0, %v59_v30 }

// kernel: _kd_forward.19
= control target key start
LH: loop header
LB: loop body
LE: loop exit
PB: predicated region body
PF: predicated region fallthrough
CT: control target
= control target key end

     0   :  { %vm12_vm0 = vcmask 7168   ;;  %v74_v3 = vmov 0.0   ;;  %s113_s0 = inlined_call_operand.vmem [shape: f32[16,256], index: 0, kind: input, shape index: {}]   ;;  %s114_s1 = inlined_call_operand.vmem [shape: f32[16,1], index: 1, kind: output, shape index: {}]  }
   0x1   :  { %v17_v0 = vld [vmem:[%s113_s0] sm:$0xff]  ;;  %v18_v1 = vld [vmem:[%s113_s0 + $0x8] sm:$0xff]  ;;  %v19_v2 = vld [vmem:[%s113_s0 + $0x10] sm:$0xff]  ;;  %15 = vst.msk [vmem:[#allocation3] sm:$0xff] %vm12_vm0, %v74_v3 }
   0x2   :  { %13 = vst.msk [vmem:[#allocation2] sm:$0xff] %vm12_vm0, %v74_v3  ;;  %14 = vst.msk [vmem:[#allocation2 + $0x8] sm:$0xff] %vm12_vm0, %v74_v3  ;;  %v36_v4 = vmul.f32 %v17_v0, %v17_v0  ;;  %v37_v5 = vmul.f32 %v18_v1, %v18_v1  ;;  %v20_v6 = vld [vmem:[%s113_s0 + $0x18] sm:$0xff]  ;;  %v38_v7 = vmul.f32 %v19_v2, %v19_v2 }
   0x3   :  { %16 = vst.msk [vmem:[#allocation3 + $0x8] sm:$0xff] %vm12_vm0, %v74_v3  ;;  %v23_v8 = vadd.f32 %v18_v1, %v17_v0  ;;  %v39_v9 = vmul.f32 %v20_v6, %v20_v6  ;;  %v26_v11 = vadd.f32 %v20_v6, %v19_v2 }
   0x4   :  { %v40_v10 = vadd.f32 %v37_v5, %v36_v4 }
   0x5   :  { %24 = vadd.xlane.f32.xlu1 %v23_v8  ;;  %v43_v12 = vadd.f32 %v39_v9, %v38_v7 }
   0x6   :  { %41 = vadd.xlane.f32.xlu0 %v40_v10 }
   0x8   :  { %v34_v14 = vld [vmem:[#allocation3] sm:$0xff] }
   0x9   :  { %27 = vadd.xlane.f32.xlu1 %v26_v11  ;;  %v21_v13 = vld [vmem:[#allocation2] sm:$0xff]  ;;  %v22_v18 = vld [vmem:[#allocation2 + $0x8] sm:$0xff] }
   0xa   :  { %44 = vadd.xlane.f32.xlu0 %v43_v12  ;;  %v35_v20 = vld [vmem:[#allocation3 + $0x8] sm:$0xff] }
  0x92   :  { %v25_v15 = vpop.xlane.xlu1 %24 }
  0x93   :  { %v29_v16 = vadd.f32 %v25_v15, %v21_v13  ;;  %v42_v17 = vpop.xlane.xlu0 %41 }
  0x94   :  { %v46_v19 = vadd.f32 %v42_v17, %v34_v14 }
  0x95   :  { %32 = vst.msk [vmem:[#allocation2] sm:$0xff] %vm12_vm0, %v29_v16 }
  0x96   :  { %v28_v21 = vpop.xlane.xlu1 %27  ;;  %48 = vst.msk [vmem:[#allocation3] sm:$0xff] %vm12_vm0, %v46_v19 }
  0x97   :  { %v30_v22 = vadd.f32 %v28_v21, %v22_v18  ;;  %v45_v23 = vpop.xlane.xlu0 %44 }
  0x98   :  { %v47_v24 = vadd.f32 %v45_v23, %v35_v20 }
  0x99   :  { %33 = vst.msk [vmem:[#allocation2 + $0x8] sm:$0xff] %vm12_vm0, %v30_v22 }
  0x9a   :  { %49 = vst.msk [vmem:[#allocation3 + $0x8] sm:$0xff] %vm12_vm0, %v47_v24 }
  0x9c   :  { %v53_v29 = vld [vmem:[#allocation2] sm:$0xff] }
  0x9d   :  { %v55_v25 = vld [vmem:[#allocation3] sm:$0xff] }
  0x9e   :  { %v57_v26 = vmax.f32 %v55_v25, 1e-24 }
  0xa0   :  { %70 = vrsqrt.f32 %v57_v26  ;;  %v54_v32 = vld [vmem:[#allocation2 + $0x8] sm:$0xff] }
  0xa1   :  { %v56_v27 = vld [vmem:[#allocation3 + $0x8] sm:$0xff] }
  0xa2   :  { %v58_v28 = vmax.f32 %v56_v27, 1e-24 }
  0xa4   :  { %72 = vrsqrt.f32 %v58_v28 }
  0xaa   :  { %v71_v30 = vpop.eup %70 }
  0xab   :  { %v61_v31 = vmul.f32 %v71_v30, %v53_v29 }
  0xad   :  { %63 = vst.msk [vmem:[%s114_s1] sm:$0xff] %vm12_vm0, %v61_v31 }
  0xae   :  { %v73_v33 = vpop.eup %72 }
  0xaf   :  { %v62_v34 = vmul.f32 %v73_v33, %v54_v32 }
  0xb1   :  { %64 = vst.msk [vmem:[%s114_s1 + $0x8] sm:$0xff] %vm12_vm0, %v62_v34 }

// kernel: squeeze.19
= control target key start
LH: loop header
LB: loop body
LE: loop exit
PB: predicated region body
PF: predicated region fallthrough
CT: control target
= control target key end

     0   :  { %vm7_vm0 = vcmask 130048   ;;  %s39_s0 = inlined_call_operand.vmem [shape: f32[32], index: 0, kind: input, shape index: {}]   ;;  %s40_s1 = inlined_call_operand.vmem [shape: f32[2,16], index: 1, kind: output, shape index: {}]  }
   0x1   :  { %v4_v0 = vld [vmem:[%s39_s0] sm:$0x1]  ;;  %s22_s0 = smov 112  }
   0x2   :  { %5 = vst [vmem:[#allocation1] sm:$0x1] %v4_v0 }
   0x9   :  { %v9_v1 = vld [vmem:[#allocation1] sm:$0x1]  }
   0xa   :  { %v6_v2 = vld [vmem:[#allocation1] sm:$0x1]   ;;  %10 = vrot.lane.b32.xlu0 %v9_v1, %s22_s0 }
   0xb   :  { %8 = vst.msk [vmem:[#allocation0] sm:$0x1] %vm7_vm0, %v6_v2  }
  0x7c   :  { %v11_v3 = vpop.permute.xlu0 %10  }
  0x7d   :  { %14 = vst.msk [vmem:[#allocation0 + $0x1] sm:$0x1] %vm7_vm0, %v11_v3  }
  0x84   :  { %v18_v4 = vld [vmem:[#allocation0] sm:$0x3] }
  0x85   :  { %20 = vst [vmem:[%s40_s1] sm:$0x3] %v18_v4 }

// kernel: _kd_forward.20
= control target key start
LH: loop header
LB: loop body
LE: loop exit
PB: predicated region body
PF: predicated region fallthrough
CT: control target
= control target key end

     0   :  { %vm12_vm0 = vcmask 7168   ;;  %vm29_vm1 = vcmask 523264   ;;  %v119_v3 = vmov 0.0   ;;  %s182_s0 = inlined_call_operand.vmem [shape: f32[32,64], index: 0, kind: input, shape index: {}]   ;;  %s183_s1 = inlined_call_operand.vmem [shape: f32[32,1], index: 1, kind: output, shape index: {}]  }
   0x1   :  { %v23_v0 = vld [vmem:[%s182_s0 + $0x10] sm:$0xff]  ;;  %v21_v1 = vld [vmem:[%s182_s0] sm:$0xff]  ;;  %v24_v2 = vld [vmem:[%s182_s0 + $0x18] sm:$0xff]  ;;  %19 = vst.msk [vmem:[#allocation3 + $0x10] sm:$0xff] %vm12_vm0, %v119_v3 }
   0x2   :  { %13 = vst.msk [vmem:[#allocation2] sm:$0xff] %vm12_vm0, %v119_v3  ;;  %14 = vst.msk [vmem:[#allocation2 + $0x8] sm:$0xff] %vm12_vm0, %v119_v3  ;;  %v57_v4 = vmul.f32 %v23_v0, %v23_v0  ;;  %v55_v5 = vmul.f32 %v21_v1, %v21_v1  ;;  %v58_v6 = vmul.f32 %v24_v2, %v24_v2  ;;  %v22_v7 = vld [vmem:[%s182_s0 + $0x8] sm:$0xff]  ;;  %v30_v13 = vsel %vm29_vm1, %v21_v1, 0.0 }
   0x3   :  { %15 = vst.msk [vmem:[#allocation2 + $0x10] sm:$0xff] %vm12_vm0, %v119_v3  ;;  %16 = vst.msk [vmem:[#allocation2 + $0x18] sm:$0xff] %vm12_vm0, %v119_v3  ;;  %v56_v8 = vmul.f32 %v22_v7, %v22_v7  ;;  %v33_v14 = vsel %vm29_vm1, %v22_v7, 0.0  ;;  %v36_v15 = vsel %vm29_vm1, %v23_v0, 0.0  ;;  %v39_v16 = vsel %vm29_vm1, %v24_v2, 0.0 }
   0x4   :  { %17 = vst.msk [vmem:[#allocation3] sm:$0xff] %vm12_vm0, %v119_v3  ;;  %18 = vst.msk [vmem:[#allocation3 + $0x8] sm:$0xff] %vm12_vm0, %v119_v3  ;;  %v65_v9 = vsel %vm29_vm1, %v57_v4, 0.0  ;;  %v59_v10 = vsel %vm29_vm1, %v55_v5, 0.0  ;;  %v68_v11 = vsel %vm29_vm1, %v58_v6, 0.0 }
   0x5   :  { %20 = vst.msk [vmem:[#allocation3 + $0x18] sm:$0xff] %vm12_vm0, %v119_v3  ;;  %66 = vadd.xlane.f32.xlu1 %v65_v9  ;;  %60 = vadd.xlane.f32.xlu0 %v59_v10  ;;  %v62_v12 = vsel %vm29_vm1, %v56_v8, 0.0 }
   0x8   :  { %v53_v17 = vld [vmem:[#allocation3 + $0x10] sm:$0xff] }
   0x9   :  { %69 = vadd.xlane.f32.xlu1 %v68_v11  ;;  %63 = vadd.xlane.f32.xlu0 %v62_v12  ;;  %v25_v29 = vld [vmem:[#allocation2] sm:$0xff]  ;;  %v26_v30 = vld [vmem:[#allocation2 + $0x8] sm:$0xff] }
   0xa   :  { %v27_v35 = vld [vmem:[#allocation2 + $0x10] sm:$0xff]  ;;  %v28_v38 = vld [vmem:[#allocation2 + $0x18] sm:$0xff] }
   0xb   :  { %v51_v18 = vld [vmem:[#allocation3] sm:$0xff]  ;;  %v52_v24 = vld [vmem:[#allocation3 + $0x8] sm:$0xff] }
   0xc   :  { %v54_v23 = vld [vmem:[#allocation3 + $0x18] sm:$0xff] }
   0xd   :  { %31 = vadd.xlane.f32.xlu0 %v30_v13  ;;  %34 = vadd.xlane.f32.xlu1 %v33_v14 }
  0x11   :  { %37 = vadd.xlane.f32.xlu0 %v36_v15  ;;  %40 = vadd.xlane.f32.xlu1 %v39_v16 }
  0x92   :  { %v67_v19 = vpop.xlane.xlu1 %66  ;;  %v61_v20 = vpop.xlane.xlu0 %60 }
  0x93   :  { %v73_v21 = vadd.f32 %v67_v19, %v53_v17  ;;  %v71_v22 = vadd.f32 %v61_v20, %v51_v18 }
  0x95   :  { %77 = vst.msk [vmem:[#allocation3 + $0x10] sm:$0xff] %vm12_vm0, %v73_v21  ;;  %75 = vst.msk [vmem:[#allocation3] sm:$0xff] %vm12_vm0, %v71_v22 }
  0x96   :  { %v70_v25 = vpop.xlane.xlu1 %69  ;;  %v64_v26 = vpop.xlane.xlu0 %63 }
  0x97   :  { %v74_v27 = vadd.f32 %v70_v25, %v54_v23  ;;  %v72_v28 = vadd.f32 %v64_v26, %v52_v24 }
  0x99   :  { %78 = vst.msk [vmem:[#allocation3 + $0x18] sm:$0xff] %vm12_vm0, %v74_v27  ;;  %76 = vst.msk [vmem:[#allocation3 + $0x8] sm:$0xff] %vm12_vm0, %v72_v28 }
  0x9a   :  { %v32_v31 = vpop.xlane.xlu0 %31  ;;  %v35_v32 = vpop.xlane.xlu1 %34 }
  0x9b   :  { %v42_v33 = vadd.f32 %v32_v31, %v25_v29  ;;  %v43_v34 = vadd.f32 %v35_v32, %v26_v30 }
  0x9c   :  { %v88_v36 = vld [vmem:[#allocation3 + $0x10] sm:$0xff]  ;;  %v86_v37 = vld [vmem:[#allocation3] sm:$0xff] }
  0x9d   :  { %v92_v39 = vmax.f32 %v88_v36, 1e-24  ;;  %v90_v40 = vmax.f32 %v86_v37, 1e-24  ;;  %47 = vst.msk [vmem:[#allocation2] sm:$0xff] %vm12_vm0, %v42_v33  ;;  %48 = vst.msk [vmem:[#allocation2 + $0x8] sm:$0xff] %vm12_vm0, %v43_v34 }
  0x9e   :  { %v38_v41 = vpop.xlane.xlu0 %37  ;;  %v41_v42 = vpop.xlane.xlu1 %40 }
  0x9f   :  { %111 = vrsqrt.f32 %v92_v39  ;;  %v44_v43 = vadd.f32 %v38_v41, %v27_v35  ;;  %v45_v44 = vadd.f32 %v41_v42, %v28_v38 }
  0xa0   :  { %113 = vrsqrt.f32 %v90_v40  ;;  %v89_v45 = vld [vmem:[#allocation3 + $0x18] sm:$0xff]  ;;  %v87_v46 = vld [vmem:[#allocation3 + $0x8] sm:$0xff] }
  0xa1   :  { %v93_v47 = vmax.f32 %v89_v45, 1e-24  ;;  %v91_v48 = vmax.f32 %v87_v46, 1e-24  ;;  %49 = vst.msk [vmem:[#allocation2 + $0x10] sm:$0xff] %vm12_vm0, %v44_v43  ;;  %50 = vst.msk [vmem:[#allocation2 + $0x18] sm:$0xff] %vm12_vm0, %v45_v44 }
  0xa3   :  { %115 = vrsqrt.f32 %v93_v47 }
  0xa4   :  { %117 = vrsqrt.f32 %v91_v48  ;;  %v82_v49 = vld [vmem:[#allocation2] sm:$0xff]  ;;  %v83_v58 = vld [vmem:[#allocation2 + $0x8] sm:$0xff] }
  0xa8   :  { %v84_v50 = vld [vmem:[#allocation2 + $0x10] sm:$0xff]  ;;  %v85_v55 = vld [vmem:[#allocation2 + $0x18] sm:$0xff] }
  0xa9   :  { %v112_v51 = vpop.eup %111 }
  0xaa   :  { %v114_v52 = vpop.eup %113  ;;  %v100_v53 = vmul.f32 %v112_v51, %v84_v50 }
  0xab   :  { %v98_v54 = vmul.f32 %v114_v52, %v82_v49 }
  0xac   :  { %104 = vst.msk [vmem:[%s183_s1 + $0x10] sm:$0xff] %vm12_vm0, %v100_v53 }
  0xad   :  { %v116_v56 = vpop.eup %115  ;;  %102 = vst.msk [vmem:[%s183_s1] sm:$0xff] %vm12_vm0, %v98_v54 }
  0xae   :  { %v118_v57 = vpop.eup %117  ;;  %v101_v59 = vmul.f32 %v116_v56, %v85_v55 }
  0xaf   :  { %v99_v60 = vmul.f32 %v118_v57, %v83_v58 }
  0xb0   :  { %105 = vst.msk [vmem:[%s183_s1 + $0x18] sm:$0xff] %vm12_vm0, %v101_v59 }
  0xb1   :  { %103 = vst.msk [vmem:[%s183_s1 + $0x8] sm:$0xff] %vm12_vm0, %v99_v60 }

// kernel: _kd_forward.29
= control target key start
LH: loop header
LB: loop body
LE: loop exit
PB: predicated region body
PF: predicated region fallthrough
CT: control target
= control target key end

     0   :  { %s446_s9 = smov 0   ;;  %s448_s10 = smov 0   ;;  %s516_s0 = inlined_call_operand.vmem [shape: f32[2,104,128], index: 0, kind: input, shape index: {}]   ;;  %s517_s1 = inlined_call_operand.vmem [shape: f32[2,104,128], index: 1, kind: input, shape index: {}]   ;;  %s518_s2 = inlined_call_operand.vmem [shape: f32[2,1,1], index: 2, kind: output, shape index: {}]  }
   0x1   :  { %s450_s11 = smov 0  }
   0x2 LB: > { %s24_s12 = sadd.s32 1, %s424_s10  ;;  %p375_p0 = scmp.ge.s32.totalorder %s428_s11, 1  ;;  %s428_s11 = sphi %s450_s11, %s12_s11   ;;  %s424_s10 = sphi %s448_s10, %s520_s10   ;;  %s420_s9 = sphi %s446_s9, %s519_s9  }
   0x3   : > { %p26_p1 = scmp.ge.s32.totalorder %s24_s12, 2  ;;  %p148_p2 = scmp.lt.s32.totalorder %s428_s11, 3 }
   0x5   : > { %s522_s12 = smov (%p26_p1, %s24_s12), 0  ;;  %p149_p3 = pnand %p375_p0, %p148_p2 }
   0x6   : > { %p182_p4 = scmp.lt.s32.totalorder (!%p149_p3), %s420_s9, 1  ;;  %v430_v0 = vmov (!%p149_p3), 0.0   ;;  %vm286_vm0 = vcmask (!%p149_p3), 1040384   ;;  %vm290_vm1 = vcmask (!%p149_p3), 0  }
   0x7   : > { %152 = sbr.rel (%p149_p3) target bundleno = 214 (0xd6), region = 28  ;;  %208 = vst [vmem:[#allocation2] sm:$0x1] (!%p149_p3), %v430_v0 }
   0xe   : > { %s524_s9 = smov (!%p182_p4, %s420_s9), 1 }
   0xf   : > { %s380_s13 = smul.u32 104, %s524_s9  ;;  %s203_s22 = scalar_lea.vmem %s518_s2, %s524_s9 }
  0x11   : > { %s470_s16 = scalar_lea.vmem %s516_s0, %s380_s13  ;;  %s475_s19 = scalar_lea.vmem %s517_s1, %s380_s13 }
  0x12   : > { %v209_v1 = vld [vmem:[%s470_s16] sm:$0xff]  ;;  %v210_v2 = vld [vmem:[%s470_s16 + $0x8] sm:$0xff]  ;;  %v211_v3 = vld [vmem:[%s470_s16 + $0x10] sm:$0xff] }
  0x13   : > { %v222_v4 = vld [vmem:[%s475_s19] sm:$0xff]  ;;  %v223_v5 = vld [vmem:[%s475_s19 + $0x8] sm:$0xff]  ;;  %v212_v6 = vld [vmem:[%s470_s16 + $0x18] sm:$0xff] }
  0x14   : > { %v224_v7 = vld [vmem:[%s475_s19 + $0x10] sm:$0xff]  ;;  %v225_v8 = vld [vmem:[%s475_s19 + $0x18] sm:$0xff]  ;;  %v235_v9 = vsub.f32 %v209_v1, %v222_v4  ;;  %v236_v10 = vsub.f32 %v210_v2, %v223_v5  ;;  %v213_v12 = vld [vmem:[%s470_s16 + $0x20] sm:$0xff] }
  0x15   : > { %v237_v11 = vsub.f32 %v211_v3, %v224_v7  ;;  %v226_v13 = vld [vmem:[%s475_s19 + $0x20] sm:$0xff]  ;;  %v238_v14 = vsub.f32 %v212_v6, %v225_v8  ;;  %v214_v17 = vld [vmem:[%s470_s16 + $0x28] sm:$0xff]  ;;  %v215_v21 = vld [vmem:[%s470_s16 + $0x30] sm:$0xff] }
  0x16   : > { %v249_v15 = vmul.f32 %v235_v9, %v235_v9  ;;  %v250_v16 = vmul.f32 %v236_v10, %v236_v10  ;;  %v227_v18 = vld [vmem:[%s475_s19 + $0x28] sm:$0xff]  ;;  %v239_v19 = vsub.f32 %v213_v12, %v226_v13  ;;  %v228_v22 = vld [vmem:[%s475_s19 + $0x30] sm:$0xff]  ;;  %v216_v26 = vld [vmem:[%s470_s16 + $0x38] sm:$0xff] }
  0x17   : > { %v251_v20 = vmul.f32 %v237_v11, %v237_v11  ;;  %v240_v23 = vsub.f32 %v214_v17, %v227_v18  ;;  %v252_v24 = vmul.f32 %v238_v14, %v238_v14  ;;  %v229_v27 = vld [vmem:[%s475_s19 + $0x38] sm:$0xff]  ;;  %v241_v28 = vsub.f32 %v215_v21, %v228_v22  ;;  %v217_v31 = vld [vmem:[%s470_s16 + $0x40] sm:$0xff]  ;;  %v218_v36 = vld [vmem:[%s470_s16 + $0x48] sm:$0xff] }
  0x18   : > { %v262_v25 = vadd.f32 %v250_v16, %v249_v15  ;;  %v253_v29 = vmul.f32 %v239_v19, %v239_v19  ;;  %v230_v32 = vld [vmem:[%s475_s19 + $0x40] sm:$0xff]  ;;  %v242_v33 = vsub.f32 %v216_v26, %v229_v27  ;;  %v231_v37 = vld [vmem:[%s475_s19 + $0x48] sm:$0xff]  ;;  %v219_v41 = vld [vmem:[%s470_s16 + $0x50] sm:$0xff] }
  0x19   : > { %v254_v34 = vmul.f32 %v240_v23, %v240_v23  ;;  %v243_v38 = vsub.f32 %v217_v31, %v230_v32  ;;  %v255_v39 = vmul.f32 %v241_v28, %v241_v28  ;;  %v232_v42 = vld [vmem:[%s475_s19 + $0x50] sm:$0xff]  ;;  %v244_v43 = vsub.f32 %v218_v36, %v231_v37  ;;  %v220_v46 = vld [vmem:[%s470_s16 + $0x58] sm:$0xff]  ;;  %v221_v51 = vld [vmem:[%s470_s16 + $0x60] sm:$0xff] }
  0x1a   : > { %v263_v30 = vadd.f32 %v262_v25, %v251_v20  ;;  %v256_v44 = vmul.f32 %v242_v33, %v242_v33  ;;  %v233_v47 = vld [vmem:[%s475_s19 + $0x58] sm:$0xff]  ;;  %v245_v48 = vsub.f32 %v219_v41, %v232_v42  ;;  %v234_v52 = vld [vmem:[%s475_s19 + $0x60] sm:$0xff] }
  0x1b   : > { %v257_v49 = vmul.f32 %v243_v38, %v243_v38  ;;  %v246_v53 = vsub.f32 %v220_v46, %v233_v47  ;;  %v258_v54 = vmul.f32 %v244_v43, %v244_v43  ;;  %v247_v56 = vsub.f32 %v221_v51, %v234_v52  ;;  %v248_v6 = vld [vmem:[#allocation2] sm:$0x1] }
  0x1c   : > { %v264_v35 = vadd.f32 %v263_v30, %v252_v24  ;;  %v259_v57 = vmul.f32 %v245_v48, %v245_v48 }
  0x1d   : > { %v260_v59 = vmul.f32 %v246_v53, %v246_v53  ;;  %v261_v61 = vmul.f32 %v247_v56, %v247_v56 }
  0x1e   : > { %v265_v40 = vadd.f32 %v264_v35, %v253_v29 }
  0x20   : > { %v266_v45 = vadd.f32 %v265_v40, %v254_v34 }
  0x22   : > { %v267_v50 = vadd.f32 %v266_v45, %v255_v39 }
  0x24   : > { %v268_v55 = vadd.f32 %v267_v50, %v256_v44 }
  0x26   : > { %v269_v58 = vadd.f32 %v268_v55, %v257_v49 }
  0x28   : > { %v270_v60 = vadd.f32 %v269_v58, %v258_v54 }
  0x2a   : > { %v271_v62 = vadd.f32 %v270_v60, %v259_v57 }
  0x2c   : > { %v272_v63 = vadd.f32 %v271_v62, %v260_v59 }
  0x2e   : > { %v273_v0 = vadd.f32 %v272_v63, %v261_v61 }
  0x30   : > { %v274_v1 = vrot.slane %v273_v0, 4 }
  0x32   : > { %v275_v2 = vadd.f32 %v274_v1, %v273_v0 }
  0x34   : > { %v276_v3 = vrot.slane %v275_v2, 2 }
  0x36   : > { %v277_v4 = vadd.f32 %v276_v3, %v275_v2 }
  0x38   : > { %v278_v5 = vrot.slane %v277_v4, 1 }
  0x3a   : > { %v279_v7 = vadd.f32 %v278_v5, %v277_v4 }
  0x3c   : > { %v280_v8 = vadd.f32 %v279_v7, %v248_v6 }
  0x3e   : > { %281 = vst [vmem:[#allocation2] sm:$0x1] %v280_v8 }
  0x45   : > { %v285_v9 = vld [vmem:[#allocation2] sm:$0x1] }
  0x46   : > { %v287_v10 = vsel %vm286_vm0, %v285_v9, 0.0 }
  0x47   : > { %288 = vadd.xlane.f32.xlu0 %v287_v10 }
  0xd4   : > { %v289_v11 = vpop.xlane.xlu0 %288 }
  0xd5   : > { %291 = vst.msk [vmem:[%s203_s22] sm:$0x1] %vm290_vm1, %v289_v11 }
  0xd6 PF: > { %s12_s11 = sadd.s32 1, %s428_s11   ;;  %s519_s9 = smov %s424_s10 }
  0xd7   : > { %p9_p5 = scmp.ge.s32.totalorder %s12_s11, 4   ;;  %s520_s10 = smov %s522_s12 }
  0xd9   :  { %11 = sbr.rel (!%p9_p5) target bundleno = 2 (0x2), region = 69 }

</bundles_post_ra>
